<compile_context>
chip_gen: v7x
topology: tpu7x:2x2x1
jax: 0.10.0
libtpu: 0.0.40
codegen_flags: <defaults>
</compile_context>

<pallas_src>
import functools

import jax
import jax.numpy as jnp
import numpy as np
from jax import lax
from jax.experimental import pallas as pl
from jax.experimental.pallas import tpu as pltpu


def _spatial_attention_kernel(w_ref, b_ref, x_ref, o_ref, *, H, W, K):
    """Processes one (Bt, C, H*W) block per grid step.

    w_ref : SMEM (2*K*K,) flattened conv weights; avg-channel already scaled by 1/C
    b_ref : SMEM (1,)     conv bias
    x_ref : VMEM (Bt, C, HW)
    o_ref : VMEM (Bt, C, HW)
    """
    Bt, C, HW = x_ref.shape
    kp = (K - 1) // 2
    P = kp * W + kp                      # flat zero-pad so every shifted window is in-bounds

    x = x_ref[...]                                         # (Bt, C, HW) f32

    # Channel aggregation (max / avg over C).  1/C is folded into the conv
    # weights, so a plain sum implements the average channel.
    pooled = (jnp.max(x, axis=1), jnp.sum(x, axis=1))      # 2 x (Bt, HW)

    # Column-validity masks per horizontal offset dx (a flat shift of dx wraps
    # across row boundaries; those positions must read as zero padding).
    # Hoisted out of the MAC loop: built once per dx, reused for both channels.
    col = lax.broadcasted_iota(jnp.int32, (1, HW), 1) % W
    col_ok = [
        jnp.logical_and(col + (dj - kp) >= 0, col + (dj - kp) < W)
        for dj in range(K)
    ]

    # Conv2d(in=2, out=1, K, padding=kp) unrolled as 2*K*K shifted MACs on the
    # lane-dense flat pooled maps.  Row shifts (dy*W) need no mask: the flat
    # zero pad of P >= W elements covers out-of-range rows.
    acc = jnp.full((Bt, HW), b_ref[0], jnp.float32)
    zpad = jnp.zeros((Bt, P), jnp.float32)
    for ci in range(2):
        pflat = jnp.concatenate([zpad, pooled[ci], zpad], axis=1)   # (Bt, HW + 2P)
        for di in range(K):
            dy = di - kp
            for dj in range(K):
                dx = dj - kp
                s = dy * W + dx
                shifted = pflat[:, P + s:P + s + HW]                # (Bt, HW)
                if dx != 0:
                    shifted = jnp.where(col_ok[dj], shifted, 0.0)
                wv = w_ref[ci * K * K + di * K + dj]                # SMEM scalar
                acc = acc + wv * shifted

    att = jax.nn.sigmoid(acc)                                       # (Bt, HW)
    # .repeat(1, C, 1, 1): identical attention map broadcast over channels.
    # Lane-dense store: last dim is HW (full multiple of 128 when H*W % 128 == 0).
    o_ref[...] = jnp.broadcast_to(att[:, None, :], (Bt, C, HW))


def _pick_block_batch(B, C, HW, budget_bytes=4 << 20):
    """Largest divisor of B whose f32 (input+output) block fits the VMEM budget."""
    per_b = 2 * C * HW * 4
    bt = int(max(1, min(B, budget_bytes // max(per_b, 1))))
    while B % bt:
        bt -= 1
    return bt


def spatial_attention(x, conv_w, conv_b, kernel_size=3):
    """x: (B, C, H, W) float32; conv_w: (1, 2, K, K); conv_b: (1,)."""
    B, C, H, W = x.shape
    K = kernel_size
    assert K % 2 == 1, "Odd kernel size required"
    HW = H * W

    # Lane-dense layout: flatten spatial dims so H*W maps onto the 128 lanes.
    x_flat = x.reshape(B, C, HW).astype(jnp.float32)

    # Flatten conv weights and fold the avg-pool 1/C into the avg-channel weights.
    w = conv_w.astype(jnp.float32).reshape(2, K * K)
    w = w * jnp.array([[1.0], [1.0 / C]], jnp.float32)
    w_flat = w.reshape(-1)                                  # (2*K*K,)
    b_flat = conv_b.reshape(-1).astype(jnp.float32)         # (1,)

    Bt = _pick_block_batch(B, C, HW)
    block_bytes = 2 * Bt * C * HW * 4                       # in + out block, f32
    # Double-buffered in+out plus headroom; capped well under v7x's 64 MiB VMEM.
    vmem_limit = int(min(48 << 20, max(4 << 20, 8 * block_bytes)))

    kernel = functools.partial(_spatial_attention_kernel, H=H, W=W, K=K)

    out = pl.pallas_call(
        kernel,
        out_shape=jax.ShapeDtypeStruct((B, C, HW), jnp.float32),
        grid_spec=pltpu.PrefetchScalarGridSpec(
            num_scalar_prefetch=0,
            grid=(B // Bt,),
            in_specs=[
                pl.BlockSpec(memory_space=pltpu.MemorySpace.SMEM),   # conv weights
                pl.BlockSpec(memory_space=pltpu.MemorySpace.SMEM),   # conv bias
                pl.BlockSpec((Bt, C, HW), lambda b: (b, 0, 0)),      # x
            ],
            out_specs=pl.BlockSpec((Bt, C, HW), lambda b: (b, 0, 0)),
        ),
        compiler_params=pltpu.CompilerParams(
            dimension_semantics=("parallel",),
            vmem_limit_bytes=vmem_limit,
        ),
    )(w_flat, b_flat, x_flat)

    return out.reshape(B, C, H, W)


def spatial_attention_ref(x, conv_w, conv_b):
    """Pure-JAX reference mirroring the PyTorch forward exactly (odd K)."""
    max_pool = jnp.max(x, axis=1, keepdims=True)           # (B,1,H,W)
    avg_pool = jnp.mean(x, axis=1, keepdims=True)          # (B,1,H,W)
    pool = jnp.concatenate([max_pool, avg_pool], axis=1)   # (B,2,H,W)
    conv = lax.conv_general_dilated(
        pool, conv_w, window_strides=(1, 1), padding="SAME",
        dimension_numbers=("NCHW", "OIHW", "NCHW"))
    conv = conv + conv_b.reshape(1, -1, 1, 1)
    conv = jnp.repeat(conv, x.shape[1], axis=1)
    return jax.nn.sigmoid(conv)


if __name__ == "__main__":
    key = jax.random.PRNGKey(0)
    kx, kw, kb = jax.random.split(key, 3)

    B, C, H, W = 2, 4, 16, 16
    K = 3

    x = jax.random.normal(kx, (B, C, H, W), dtype=jnp.float32)
    conv_w = 0.3 * jax.random.normal(kw, (1, 2, K, K), dtype=jnp.float32)
    conv_b = 0.1 * jax.random.normal(kb, (1,), dtype=jnp.float32)

    out = spatial_attention(x, conv_w, conv_b, kernel_size=K)
    out = jax.block_until_ready(out)

    ref = spatial_attention_ref(x, conv_w, conv_b)
    np.testing.assert_allclose(np.asarray(out), np.asarray(ref),
                               rtol=1e-5, atol=1e-5)

    print("KERNEL_OK")
</pallas_src>

<mosaic_0001>
module attributes {stable_mosaic.version = 11 : i64} {
  func.func @_spatial_attention_kernel(%arg0: i32, %arg1: memref<18xf32, #tpu.memory_space<smem>>, %arg2: memref<1xf32, #tpu.memory_space<smem>>, %arg3: memref<2x4x256xf32, #tpu.memory_space<vmem>>, %arg4: memref<2x4x256xf32, #tpu.memory_space<vmem>>) attributes {dimension_semantics = [#tpu.dimension_semantics<parallel>], iteration_bounds = array<i64: 1>, scalar_prefetch = 0 : i64, scratch_operands = 0 : i64, tpu.core_type = #tpu.core_type<tc>, window_params = [{transform_indices = @transform_0, window_bounds = array<i64: 18>}, {transform_indices = @transform_1, window_bounds = array<i64: 1>}, {transform_indices = @transform_2, window_bounds = array<i64: 2, 4, 256>}, {transform_indices = @transform_3, window_bounds = array<i64: 2, 4, 256>}]} {
    %c0 = arith.constant 0 : index
    %c0_0 = arith.constant 0 : index
    %c0_1 = arith.constant 0 : index
    %0 = vector.load %arg3[%c0, %c0_0, %c0_1] : memref<2x4x256xf32, #tpu.memory_space<vmem>>, vector<2x4x256xf32>
    %cst = arith.constant dense<0xFF800000> : vector<2x256xf32>
    %1 = vector.multi_reduction <maximumf>, %0, %cst [1] : vector<2x4x256xf32> to vector<2x256xf32>
    %cst_2 = arith.constant dense<0.000000e+00> : vector<2x256xf32>
    %2 = vector.multi_reduction <add>, %0, %cst_2 [1] : vector<2x4x256xf32> to vector<2x256xf32>
    %3 = tpu.iota {dimensions = array<i32: 1>} : vector<1x256xi32>
    %c16_i32 = arith.constant 16 : i32
    %c0_i32 = arith.constant 0 : i32
    %4 = arith.cmpi eq, %c16_i32, %c0_i32 : i32
    %c1_i32 = arith.constant 1 : i32
    %5 = arith.select %4, %c1_i32, %c16_i32 : i32
    %6 = vector.broadcast %5 : i32 to vector<1x256xi32>
    %7 = arith.remsi %3, %6 : vector<1x256xi32>
    %c0_i32_3 = arith.constant 0 : i32
    %8 = vector.broadcast %c0_i32_3 : i32 to vector<1x256xi32>
    %9 = arith.cmpi ne, %7, %8 : vector<1x256xi32>
    %c0_i32_4 = arith.constant 0 : i32
    %10 = vector.broadcast %c0_i32_4 : i32 to vector<1x256xi32>
    %11 = arith.cmpi slt, %7, %10 : vector<1x256xi32>
    %c0_i32_5 = arith.constant 0 : i32
    %12 = arith.cmpi slt, %5, %c0_i32_5 : i32
    %13 = vector.broadcast %12 : i1 to vector<1x256xi1>
    %14 = vector.broadcast %13 : vector<1x256xi1> to vector<1x256xi1>
    %15 = arith.xori %11, %14 : vector<1x256xi1>
    %16 = arith.andi %15, %9 : vector<1x256xi1>
    %17 = vector.broadcast %5 : i32 to vector<1x256xi32>
    %18 = arith.addi %7, %17 : vector<1x256xi32>
    %19 = arith.select %16, %18, %7 : vector<1x256xi1>, vector<1x256xi32>
    %c-1_i32 = arith.constant -1 : i32
    %20 = vector.broadcast %c-1_i32 : i32 to vector<1x256xi32>
    %21 = arith.addi %19, %20 : vector<1x256xi32>
    %c0_i32_6 = arith.constant 0 : i32
    %22 = vector.broadcast %c0_i32_6 : i32 to vector<1x256xi32>
    %23 = arith.cmpi sge, %21, %22 : vector<1x256xi32>
    %c-1_i32_7 = arith.constant -1 : i32
    %24 = vector.broadcast %c-1_i32_7 : i32 to vector<1x256xi32>
    %25 = arith.addi %19, %24 : vector<1x256xi32>
    %c16_i32_8 = arith.constant 16 : i32
    %26 = vector.broadcast %c16_i32_8 : i32 to vector<1x256xi32>
    %27 = arith.cmpi slt, %25, %26 : vector<1x256xi32>
    %28 = arith.andi %23, %27 : vector<1x256xi1>
    %c1_i32_9 = arith.constant 1 : i32
    %29 = vector.broadcast %c1_i32_9 : i32 to vector<1x256xi32>
    %30 = arith.addi %19, %29 : vector<1x256xi32>
    %c0_i32_10 = arith.constant 0 : i32
    %31 = vector.broadcast %c0_i32_10 : i32 to vector<1x256xi32>
    %32 = arith.cmpi sge, %30, %31 : vector<1x256xi32>
    %c1_i32_11 = arith.constant 1 : i32
    %33 = vector.broadcast %c1_i32_11 : i32 to vector<1x256xi32>
    %34 = arith.addi %19, %33 : vector<1x256xi32>
    %c16_i32_12 = arith.constant 16 : i32
    %35 = vector.broadcast %c16_i32_12 : i32 to vector<1x256xi32>
    %36 = arith.cmpi slt, %34, %35 : vector<1x256xi32>
    %37 = arith.andi %32, %36 : vector<1x256xi1>
    %c0_13 = arith.constant 0 : index
    %38 = memref.load %arg2[%c0_13] : memref<1xf32, #tpu.memory_space<smem>>
    %39 = vector.broadcast %38 : f32 to vector<2x256xf32>
    %cst_14 = arith.constant 0.000000e+00 : f32
    %40 = vector.broadcast %cst_14 : f32 to vector<2x17xf32>
    %41 = tpu.concatenate %40, %1, %40 in 1 : vector<2x17xf32>, vector<2x256xf32>, vector<2x17xf32> -> vector<2x290xf32>
    %42 = vector.extract_strided_slice %41 {offsets = [0, 0], sizes = [2, 256], strides = [1, 1]} : vector<2x290xf32> to vector<2x256xf32>
    %cst_15 = arith.constant 0.000000e+00 : f32
    %43 = vector.shape_cast %28 : vector<1x256xi1> to vector<1x256xi1>
    %44 = vector.broadcast %43 : vector<1x256xi1> to vector<2x256xi1>
    %45 = vector.broadcast %cst_15 : f32 to vector<2x256xf32>
    %46 = arith.select %44, %42, %45 : vector<2x256xi1>, vector<2x256xf32>
    %c0_16 = arith.constant 0 : index
    %47 = memref.load %arg1[%c0_16] : memref<18xf32, #tpu.memory_space<smem>>
    %48 = vector.broadcast %47 : f32 to vector<2x256xf32>
    %49 = arith.mulf %48, %46 : vector<2x256xf32>
    %50 = arith.addf %39, %49 : vector<2x256xf32>
    %51 = vector.extract_strided_slice %41 {offsets = [0, 1], sizes = [2, 256], strides = [1, 1]} : vector<2x290xf32> to vector<2x256xf32>
    %c1 = arith.constant 1 : index
    %52 = memref.load %arg1[%c1] : memref<18xf32, #tpu.memory_space<smem>>
    %53 = vector.broadcast %52 : f32 to vector<2x256xf32>
    %54 = arith.mulf %53, %51 : vector<2x256xf32>
    %55 = arith.addf %50, %54 : vector<2x256xf32>
    %56 = vector.extract_strided_slice %41 {offsets = [0, 2], sizes = [2, 256], strides = [1, 1]} : vector<2x290xf32> to vector<2x256xf32>
    %cst_17 = arith.constant 0.000000e+00 : f32
    %57 = vector.shape_cast %37 : vector<1x256xi1> to vector<1x256xi1>
    %58 = vector.broadcast %57 : vector<1x256xi1> to vector<2x256xi1>
    %59 = vector.broadcast %cst_17 : f32 to vector<2x256xf32>
    %60 = arith.select %58, %56, %59 : vector<2x256xi1>, vector<2x256xf32>
    %c2 = arith.constant 2 : index
    %61 = memref.load %arg1[%c2] : memref<18xf32, #tpu.memory_space<smem>>
    %62 = vector.broadcast %61 : f32 to vector<2x256xf32>
    %63 = arith.mulf %62, %60 : vector<2x256xf32>
    %64 = arith.addf %55, %63 : vector<2x256xf32>
    %65 = vector.extract_strided_slice %41 {offsets = [0, 16], sizes = [2, 256], strides = [1, 1]} : vector<2x290xf32> to vector<2x256xf32>
    %cst_18 = arith.constant 0.000000e+00 : f32
    %66 = vector.shape_cast %28 : vector<1x256xi1> to vector<1x256xi1>
    %67 = vector.broadcast %66 : vector<1x256xi1> to vector<2x256xi1>
    %68 = vector.broadcast %cst_18 : f32 to vector<2x256xf32>
    %69 = arith.select %67, %65, %68 : vector<2x256xi1>, vector<2x256xf32>
    %c3 = arith.constant 3 : index
    %70 = memref.load %arg1[%c3] : memref<18xf32, #tpu.memory_space<smem>>
    %71 = vector.broadcast %70 : f32 to vector<2x256xf32>
    %72 = arith.mulf %71, %69 : vector<2x256xf32>
    %73 = arith.addf %64, %72 : vector<2x256xf32>
    %74 = vector.extract_strided_slice %41 {offsets = [0, 17], sizes = [2, 256], strides = [1, 1]} : vector<2x290xf32> to vector<2x256xf32>
    %c4 = arith.constant 4 : index
    %75 = memref.load %arg1[%c4] : memref<18xf32, #tpu.memory_space<smem>>
    %76 = vector.broadcast %75 : f32 to vector<2x256xf32>
    %77 = arith.mulf %76, %74 : vector<2x256xf32>
    %78 = arith.addf %73, %77 : vector<2x256xf32>
    %79 = vector.extract_strided_slice %41 {offsets = [0, 18], sizes = [2, 256], strides = [1, 1]} : vector<2x290xf32> to vector<2x256xf32>
    %cst_19 = arith.constant 0.000000e+00 : f32
    %80 = vector.shape_cast %37 : vector<1x256xi1> to vector<1x256xi1>
    %81 = vector.broadcast %80 : vector<1x256xi1> to vector<2x256xi1>
    %82 = vector.broadcast %cst_19 : f32 to vector<2x256xf32>
    %83 = arith.select %81, %79, %82 : vector<2x256xi1>, vector<2x256xf32>
    %c5 = arith.constant 5 : index
    %84 = memref.load %arg1[%c5] : memref<18xf32, #tpu.memory_space<smem>>
    %85 = vector.broadcast %84 : f32 to vector<2x256xf32>
    %86 = arith.mulf %85, %83 : vector<2x256xf32>
    %87 = arith.addf %78, %86 : vector<2x256xf32>
    %88 = vector.extract_strided_slice %41 {offsets = [0, 32], sizes = [2, 256], strides = [1, 1]} : vector<2x290xf32> to vector<2x256xf32>
    %cst_20 = arith.constant 0.000000e+00 : f32
    %89 = vector.shape_cast %28 : vector<1x256xi1> to vector<1x256xi1>
    %90 = vector.broadcast %89 : vector<1x256xi1> to vector<2x256xi1>
    %91 = vector.broadcast %cst_20 : f32 to vector<2x256xf32>
    %92 = arith.select %90, %88, %91 : vector<2x256xi1>, vector<2x256xf32>
    %c6 = arith.constant 6 : index
    %93 = memref.load %arg1[%c6] : memref<18xf32, #tpu.memory_space<smem>>
    %94 = vector.broadcast %93 : f32 to vector<2x256xf32>
    %95 = arith.mulf %94, %92 : vector<2x256xf32>
    %96 = arith.addf %87, %95 : vector<2x256xf32>
    %97 = vector.extract_strided_slice %41 {offsets = [0, 33], sizes = [2, 256], strides = [1, 1]} : vector<2x290xf32> to vector<2x256xf32>
    %c7 = arith.constant 7 : index
    %98 = memref.load %arg1[%c7] : memref<18xf32, #tpu.memory_space<smem>>
    %99 = vector.broadcast %98 : f32 to vector<2x256xf32>
    %100 = arith.mulf %99, %97 : vector<2x256xf32>
    %101 = arith.addf %96, %100 : vector<2x256xf32>
    %102 = vector.extract_strided_slice %41 {offsets = [0, 34], sizes = [2, 256], strides = [1, 1]} : vector<2x290xf32> to vector<2x256xf32>
    %cst_21 = arith.constant 0.000000e+00 : f32
    %103 = vector.shape_cast %37 : vector<1x256xi1> to vector<1x256xi1>
    %104 = vector.broadcast %103 : vector<1x256xi1> to vector<2x256xi1>
    %105 = vector.broadcast %cst_21 : f32 to vector<2x256xf32>
    %106 = arith.select %104, %102, %105 : vector<2x256xi1>, vector<2x256xf32>
    %c8 = arith.constant 8 : index
    %107 = memref.load %arg1[%c8] : memref<18xf32, #tpu.memory_space<smem>>
    %108 = vector.broadcast %107 : f32 to vector<2x256xf32>
    %109 = arith.mulf %108, %106 : vector<2x256xf32>
    %110 = arith.addf %101, %109 : vector<2x256xf32>
    %111 = tpu.concatenate %40, %2, %40 in 1 : vector<2x17xf32>, vector<2x256xf32>, vector<2x17xf32> -> vector<2x290xf32>
    %112 = vector.extract_strided_slice %111 {offsets = [0, 0], sizes = [2, 256], strides = [1, 1]} : vector<2x290xf32> to vector<2x256xf32>
    %cst_22 = arith.constant 0.000000e+00 : f32
    %113 = vector.shape_cast %28 : vector<1x256xi1> to vector<1x256xi1>
    %114 = vector.broadcast %113 : vector<1x256xi1> to vector<2x256xi1>
    %115 = vector.broadcast %cst_22 : f32 to vector<2x256xf32>
    %116 = arith.select %114, %112, %115 : vector<2x256xi1>, vector<2x256xf32>
    %c9 = arith.constant 9 : index
    %117 = memref.load %arg1[%c9] : memref<18xf32, #tpu.memory_space<smem>>
    %118 = vector.broadcast %117 : f32 to vector<2x256xf32>
    %119 = arith.mulf %118, %116 : vector<2x256xf32>
    %120 = arith.addf %110, %119 : vector<2x256xf32>
    %121 = vector.extract_strided_slice %111 {offsets = [0, 1], sizes = [2, 256], strides = [1, 1]} : vector<2x290xf32> to vector<2x256xf32>
    %c10 = arith.constant 10 : index
    %122 = memref.load %arg1[%c10] : memref<18xf32, #tpu.memory_space<smem>>
    %123 = vector.broadcast %122 : f32 to vector<2x256xf32>
    %124 = arith.mulf %123, %121 : vector<2x256xf32>
    %125 = arith.addf %120, %124 : vector<2x256xf32>
    %126 = vector.extract_strided_slice %111 {offsets = [0, 2], sizes = [2, 256], strides = [1, 1]} : vector<2x290xf32> to vector<2x256xf32>
    %cst_23 = arith.constant 0.000000e+00 : f32
    %127 = vector.shape_cast %37 : vector<1x256xi1> to vector<1x256xi1>
    %128 = vector.broadcast %127 : vector<1x256xi1> to vector<2x256xi1>
    %129 = vector.broadcast %cst_23 : f32 to vector<2x256xf32>
    %130 = arith.select %128, %126, %129 : vector<2x256xi1>, vector<2x256xf32>
    %c11 = arith.constant 11 : index
    %131 = memref.load %arg1[%c11] : memref<18xf32, #tpu.memory_space<smem>>
    %132 = vector.broadcast %131 : f32 to vector<2x256xf32>
    %133 = arith.mulf %132, %130 : vector<2x256xf32>
    %134 = arith.addf %125, %133 : vector<2x256xf32>
    %135 = vector.extract_strided_slice %111 {offsets = [0, 16], sizes = [2, 256], strides = [1, 1]} : vector<2x290xf32> to vector<2x256xf32>
    %cst_24 = arith.constant 0.000000e+00 : f32
    %136 = vector.shape_cast %28 : vector<1x256xi1> to vector<1x256xi1>
    %137 = vector.broadcast %136 : vector<1x256xi1> to vector<2x256xi1>
    %138 = vector.broadcast %cst_24 : f32 to vector<2x256xf32>
    %139 = arith.select %137, %135, %138 : vector<2x256xi1>, vector<2x256xf32>
    %c12 = arith.constant 12 : index
    %140 = memref.load %arg1[%c12] : memref<18xf32, #tpu.memory_space<smem>>
    %141 = vector.broadcast %140 : f32 to vector<2x256xf32>
    %142 = arith.mulf %141, %139 : vector<2x256xf32>
    %143 = arith.addf %134, %142 : vector<2x256xf32>
    %144 = vector.extract_strided_slice %111 {offsets = [0, 17], sizes = [2, 256], strides = [1, 1]} : vector<2x290xf32> to vector<2x256xf32>
    %c13 = arith.constant 13 : index
    %145 = memref.load %arg1[%c13] : memref<18xf32, #tpu.memory_space<smem>>
    %146 = vector.broadcast %145 : f32 to vector<2x256xf32>
    %147 = arith.mulf %146, %144 : vector<2x256xf32>
    %148 = arith.addf %143, %147 : vector<2x256xf32>
    %149 = vector.extract_strided_slice %111 {offsets = [0, 18], sizes = [2, 256], strides = [1, 1]} : vector<2x290xf32> to vector<2x256xf32>
    %cst_25 = arith.constant 0.000000e+00 : f32
    %150 = vector.shape_cast %37 : vector<1x256xi1> to vector<1x256xi1>
    %151 = vector.broadcast %150 : vector<1x256xi1> to vector<2x256xi1>
    %152 = vector.broadcast %cst_25 : f32 to vector<2x256xf32>
    %153 = arith.select %151, %149, %152 : vector<2x256xi1>, vector<2x256xf32>
    %c14 = arith.constant 14 : index
    %154 = memref.load %arg1[%c14] : memref<18xf32, #tpu.memory_space<smem>>
    %155 = vector.broadcast %154 : f32 to vector<2x256xf32>
    %156 = arith.mulf %155, %153 : vector<2x256xf32>
    %157 = arith.addf %148, %156 : vector<2x256xf32>
    %158 = vector.extract_strided_slice %111 {offsets = [0, 32], sizes = [2, 256], strides = [1, 1]} : vector<2x290xf32> to vector<2x256xf32>
    %cst_26 = arith.constant 0.000000e+00 : f32
    %159 = vector.shape_cast %28 : vector<1x256xi1> to vector<1x256xi1>
    %160 = vector.broadcast %159 : vector<1x256xi1> to vector<2x256xi1>
    %161 = vector.broadcast %cst_26 : f32 to vector<2x256xf32>
    %162 = arith.select %160, %158, %161 : vector<2x256xi1>, vector<2x256xf32>
    %c15 = arith.constant 15 : index
    %163 = memref.load %arg1[%c15] : memref<18xf32, #tpu.memory_space<smem>>
    %164 = vector.broadcast %163 : f32 to vector<2x256xf32>
    %165 = arith.mulf %164, %162 : vector<2x256xf32>
    %166 = arith.addf %157, %165 : vector<2x256xf32>
    %167 = vector.extract_strided_slice %111 {offsets = [0, 33], sizes = [2, 256], strides = [1, 1]} : vector<2x290xf32> to vector<2x256xf32>
    %c16 = arith.constant 16 : index
    %168 = memref.load %arg1[%c16] : memref<18xf32, #tpu.memory_space<smem>>
    %169 = vector.broadcast %168 : f32 to vector<2x256xf32>
    %170 = arith.mulf %169, %167 : vector<2x256xf32>
    %171 = arith.addf %166, %170 : vector<2x256xf32>
    %172 = vector.extract_strided_slice %111 {offsets = [0, 34], sizes = [2, 256], strides = [1, 1]} : vector<2x290xf32> to vector<2x256xf32>
    %cst_27 = arith.constant 0.000000e+00 : f32
    %173 = vector.shape_cast %37 : vector<1x256xi1> to vector<1x256xi1>
    %174 = vector.broadcast %173 : vector<1x256xi1> to vector<2x256xi1>
    %175 = vector.broadcast %cst_27 : f32 to vector<2x256xf32>
    %176 = arith.select %174, %172, %175 : vector<2x256xi1>, vector<2x256xf32>
    %c17 = arith.constant 17 : index
    %177 = memref.load %arg1[%c17] : memref<18xf32, #tpu.memory_space<smem>>
    %178 = vector.broadcast %177 : f32 to vector<2x256xf32>
    %179 = arith.mulf %178, %176 : vector<2x256xf32>
    %180 = arith.addf %171, %179 : vector<2x256xf32>
    %181 = arith.negf %180 : vector<2x256xf32>
    %182 = math.exp %181 : vector<2x256xf32>
    %cst_28 = arith.constant 1.000000e+00 : f32
    %183 = vector.broadcast %cst_28 : f32 to vector<2x256xf32>
    %184 = arith.addf %183, %182 : vector<2x256xf32>
    %185 = arith.divf %183, %184 : vector<2x256xf32>
    %186 = vector.shape_cast %185 : vector<2x256xf32> to vector<2x1x256xf32>
    %187 = vector.shape_cast %186 : vector<2x1x256xf32> to vector<2x1x256xf32>
    %188 = vector.broadcast %187 : vector<2x1x256xf32> to vector<2x4x256xf32>
    %c0_29 = arith.constant 0 : index
    %c0_30 = arith.constant 0 : index
    %c0_31 = arith.constant 0 : index
    %189 = vector.load %arg4[%c0_29, %c0_30, %c0_31] : memref<2x4x256xf32, #tpu.memory_space<vmem>>, vector<2x4x256xf32>
    tpu.vector_store %arg4[%c0_29, %c0_30, %c0_31], %188 {strides = array<i32>} : memref<2x4x256xf32, #tpu.memory_space<vmem>>, vector<2x4x256xf32>,
    return
  }
  func.func @transform_0(%arg0: i32) -> i32 {
    %c0_i32 = arith.constant 0 : i32
    %c0_i32_0 = arith.constant 0 : i32
    return %c0_i32 : i32
  }
  func.func @transform_1(%arg0: i32) -> i32 {
    %c0_i32 = arith.constant 0 : i32
    %c0_i32_0 = arith.constant 0 : i32
    return %c0_i32 : i32
  }
  func.func @transform_2(%arg0: i32) -> (i32, i32, i32) {
    %c0_i32 = arith.constant 0 : i32
    %c0_i32_0 = arith.constant 0 : i32
    %c0_i32_1 = arith.constant 0 : i32
    return %arg0, %c0_i32, %c0_i32_0 : i32, i32, i32
  }
  func.func @transform_3(%arg0: i32) -> (i32, i32, i32) {
    %c0_i32 = arith.constant 0 : i32
    %c0_i32_0 = arith.constant 0 : i32
    %c0_i32_1 = arith.constant 0 : i32
    return %arg0, %c0_i32, %c0_i32_0 : i32, i32, i32
  }
}

</mosaic_0001>

<bundles_post_ra>
// kernel: tpu_custom_call.1
= control target key start
LH: loop header
LB: loop body
LE: loop exit
PB: predicated region body
PF: predicated region fallthrough
CT: control target
= control target key end

     0   :  { %9 = vsyncpa [#allocation6], 0  ;;  %s1096_s0 = inlined_call_operand.vmem [shape: f32[18], index: 0, kind: input, shape index: {}]   ;;  %s1097_s1 = inlined_call_operand.<no memory space> [shape: f32[1], index: 1, kind: input, shape index: {}]   ;;  %s1098_s2 = inlined_call_operand.hbm [shape: f32[2,4,256], index: 2, kind: input, shape index: {}]   ;;  %s1099_s3 = inlined_call_operand.hbm [shape: f32[2,4,256], index: 3, kind: output, shape index: {}]  }
   0x1   :  { %10 = vsyncpa [#allocation4], 0 }
   0x2   :  { %11 = vsyncpa [#allocation5], 0  ;;  %s18_s14 = sshll.u32 %s1096_s0, 4  ;;  %s19_s14 = int_to_ptr.vmem [resolvable:$true] %s18_s14 }
   0x3   :  { %s644_s15 = scalar_lea.vmem %s19_s14, 16  ;;  %p649_p1 = scmp.lt.s32.totalorder %s19_s14, %s19_s14 }
   0x4   :  { %p645_p0 = scmp.ne.s32.totalorder %s19_s14, %s644_s15  ;;  %p650_p2 = scmp.lt.s32.totalorder %s644_s15, %s644_s15 }
   0x6   :  { %p651_p3 = por %p650_p2, %p649_p1 }
   0x8   :  { %p652_p4 = pnand %p651_p3, %p645_p0 }
   0xa   :  { %655 = shalt.err (!%p652_p4)
}
   0xb   :  { %s706_s16 = smov [#allocation3]   ;;  %s707_s17 = smov [#allocation7]  }
   0xc   :  { %21 = dma.vmem_to_smem %s19_s14, 16, %s706_s16, [#allocation6]  }
   0xd   :  { %s29_s18 = sshll.u32 %s707_s17, 4  ;;  %s656_s21 = scalar_lea.hbm %s1098_s2, 256  ;;  %s30_s18 = int_to_ptr.vmem [resolvable:$true] %s29_s18 }
   0xe   :  { %p657_p5 = scmp.ne.s32.totalorder %s1098_s2, %s656_s21  ;;  %p660_p6 = scmp.lt.u32.totalorder %s656_s21, %s1098_s2 }
  0x10   :  { %p662_p7 = pnand %p660_p6, %p657_p5 }
  0x12   :  { %665 = shalt.err (!%p662_p7)
}
  0x13   :  { %s666_s25 = scalar_lea.vmem %s30_s18, 256  ;;  %p671_p9 = scmp.lt.s32.totalorder %s30_s18, %s30_s18 }
  0x14   :  { %p667_p8 = scmp.ne.s32.totalorder %s30_s18, %s666_s25  ;;  %p672_p10 = scmp.lt.s32.totalorder %s666_s25, %s666_s25 }
  0x16   :  { %p673_p11 = por %p672_p10, %p671_p9 }
  0x18   :  { %p674_p12 = pnand %p673_p11, %p667_p8 }
  0x1a   :  { %677 = shalt.err (!%p674_p12)
}
  0x1b   :  { %s708_s26 = smov 128   ;;  %s709_s27 = smov 8  }
  0x1c   :  { %35 = dma.hbm_to_vmem [thread:$0]  %s1098_s2, 256, %s30_s18, [#allocation4], %s708_s26, %s708_s26, %s709_s27  }
  0x1d   :  { %700 = dma.done.wait [#allocation6], 16  }
  0x1e   :  { %701 = vsyncadd [#allocation6], 4294967280 }
  0x1f   :  { %702 = dma.done.wait [#allocation4], 256  }
  0x20   :  { %703 = vsyncadd [#allocation4], 4294967040 }
  0x21   :  { %42 = sfence }
  0x22   :  { %v43_v0 = vld [vmem:[#allocation7] sm:$0xff]  ;;  %v44_v1 = vld [vmem:[#allocation7 + $0x8] sm:$0xff]  ;;  %vm51_vm0 = vcmask 1043456   ;;  %vm157_vm1 = vcmask 1041409   ;;  %s710_s2 = smov 17   ;;  %vm164_vm2 = vcmask 138240  }
  0x23   :  { %v52_v2 = vsel %vm51_vm0, %v43_v0, -inf  ;;  %v66_v3 = vsel %vm51_vm0, %v44_v1, -inf  ;;  %v80_v4 = vsel %vm51_vm0, %v43_v0, 0.0  ;;  %v94_v5 = vsel %vm51_vm0, %v44_v1, 0.0  ;;  %s711_s30 = smov 110   ;;  %s712_s4 = smov 126  }
  0x24   :  { %v53_v6 = vrot.slane %v52_v2, 4  ;;  %v67_v7 = vrot.slane %v66_v3, 4  ;;  %v81_v8 = vrot.slane %v80_v4, 4  ;;  %v95_v9 = vrot.slane %v94_v5, 4  ;;  %s713_s5 = smov 96   ;;  %s714_s6 = smov 112  }
  0x25   :  { %v47_v10 = vcombine.high %v43_v0, %v43_v0  ;;  %v48_v11 = vcombine.high %v44_v1, %v44_v1  ;;  %s600_s7 = sld [smem:[#allocation3 + $0x1]]  ;;  %s715_s8 = smov 94   ;;  %vm216_vm5 = vcmask 1031168   ;;  %vm235_vm8 = vcmask 916480  }
  0x26   :  { %v54_v12 = vmax.f32 %v52_v2, %v53_v6  ;;  %v68_v13 = vmax.f32 %v66_v3, %v67_v7  ;;  %v82_v14 = vadd.f32 %v81_v8, %v80_v4  ;;  %v96_v15 = vadd.f32 %v95_v9, %v94_v5  ;;  %s603_s9 = sld [smem:[#allocation3 + $0x4]]  ;;  %s716_s10 = smov 127  }
  0x27   :  { %v59_v16 = vsel %vm51_vm0, %v47_v10, -inf  ;;  %v73_v17 = vsel %vm51_vm0, %v48_v11, -inf  ;;  %v87_v18 = vsel %vm51_vm0, %v47_v10, 0.0  ;;  %v101_v19 = vsel %vm51_vm0, %v48_v11, 0.0  ;;  %s606_s11 = sld [smem:[#allocation3 + $0x7]]  ;;  %s717_s12 = smov 111  }
  0x28   :  { %v55_v20 = vrot.slane %v54_v12, 2  ;;  %v69_v21 = vrot.slane %v68_v13, 2  ;;  %v83_v22 = vrot.slane %v82_v14, 2  ;;  %v97_v23 = vrot.slane %v96_v15, 2  ;;  %s609_s13 = sld [smem:[#allocation3 + $0xa]]  ;;  %s718_s14 = smov 95  }
  0x29   :  { %v60_v24 = vrot.slane %v59_v16, 4  ;;  %v74_v25 = vrot.slane %v73_v17, 4  ;;  %v88_v26 = vrot.slane %v87_v18, 4  ;;  %v102_v27 = vrot.slane %v101_v19, 4  ;;  %s612_s15 = sld [smem:[#allocation3 + $0xd]]  ;;  %s615_s16 = sld [smem:[#allocation3 + $0x10]] }
  0x2a   :  { %v56_v28 = vmax.f32 %v54_v12, %v55_v20  ;;  %v70_v29 = vmax.f32 %v68_v13, %v69_v21  ;;  %v84_v30 = vadd.f32 %v83_v22, %v82_v14  ;;  %v98_v31 = vadd.f32 %v97_v23, %v96_v15  ;;  %s177_s17 = sld [smem:[#allocation3]]  ;;  %s908_s18 = sld [smem:[#allocation3 + $0x2]] }
  0x2b   :  { %v61_v32 = vmax.f32 %v59_v16, %v60_v24  ;;  %v75_v33 = vmax.f32 %v73_v17, %v74_v25  ;;  %v89_v34 = vadd.f32 %v88_v26, %v87_v18  ;;  %v103_v35 = vadd.f32 %v102_v27, %v101_v19  ;;  %s928_s19 = sld [smem:[#allocation3 + $0x3]]  ;;  %s936_s20 = sld [smem:[#allocation3 + $0x5]] }
  0x2c   :  { %v57_v36 = vrot.slane %v56_v28, 1  ;;  %v71_v37 = vrot.slane %v70_v29, 1  ;;  %v85_v38 = vrot.slane %v84_v30, 1  ;;  %v99_v39 = vrot.slane %v98_v31, 1  ;;  %s946_s23 = sld [smem:[#allocation3 + $0x6]]  ;;  %s972_s0 = sld [smem:[#allocation3 + $0x9]] }
  0x2d   :  { %v62_v40 = vrot.slane %v61_v32, 2  ;;  %v76_v41 = vrot.slane %v75_v33, 2  ;;  %v90_v42 = vrot.slane %v89_v34, 2  ;;  %v104_v43 = vrot.slane %v103_v35, 2  ;;  %s996_s24 = sld [smem:[#allocation3 + $0xb]]  ;;  %s1001_s25 = sld [smem:[#allocation3 + $0xc]] }
  0x2e   :  { %v58_v44 = vmax.f32 %v56_v28, %v57_v36  ;;  %v72_v45 = vmax.f32 %v70_v29, %v71_v37  ;;  %v86_v46 = vadd.f32 %v85_v38, %v84_v30  ;;  %v100_v47 = vadd.f32 %v99_v39, %v98_v31  ;;  %s1015_s28 = sld [smem:[#allocation3 + $0xe]]  ;;  %s1032_s29 = sld [smem:[#allocation3 + $0xf]] }
  0x2f   :  { %v63_v48 = vmax.f32 %v61_v32, %v62_v40  ;;  %v77_v49 = vmax.f32 %v75_v33, %v76_v41  ;;  %v91_v50 = vadd.f32 %v90_v42, %v89_v34  ;;  %v105_v51 = vadd.f32 %v104_v43, %v103_v35 }
  0x30   :  { %v158_v52 = vsel %vm157_vm1, %v72_v45, %v58_v44  ;;  %v351_v53 = vsel %vm157_vm1, %v100_v47, %v86_v46  ;;  %v184_v6 = vstv %s600_s7  ;;  %v249_v9 = vstv %s603_s9 }
  0x31   :  { %160 = vrot.lane.b32.xlu0 %v158_v52, %s710_s2  ;;  %353 = vrot.lane.b32.xlu1 %v351_v53, %s710_s2  ;;  %v64_v54 = vrot.slane %v63_v48, 1  ;;  %v78_v55 = vrot.slane %v77_v49, 1  ;;  %v92_v56 = vrot.slane %v91_v50, 1  ;;  %v106_v57 = vrot.slane %v105_v51, 1 }
  0x32   :  { %v308_v11 = vstv %s606_s11  ;;  %v372_v16 = vstv %s609_s13  ;;  %v430_v18 = vstv %s612_s15  ;;  %v486_v30 = vstv %s615_s16 }
  0x33   :  { %v65_v58 = vmax.f32 %v63_v48, %v64_v54  ;;  %v79_v59 = vmax.f32 %v77_v49, %v78_v55  ;;  %v93_v60 = vadd.f32 %v92_v56, %v91_v50  ;;  %v107_v61 = vadd.f32 %v106_v57, %v105_v51 }
  0x34   :  { %v108_v50 = vlaneseq  ;;  %vm197_vm9 = vcmask 1039360   ;;  %vm275_vm10 = vcmask 900096   ;;  %vm294_vm11 = vcmask 785408  }
  0x35   :  { %v159_v62 = vsel %vm157_vm1, %v79_v59, %v65_v58  ;;  %v352_v63 = vsel %vm157_vm1, %v107_v61, %v93_v60  ;;  %vm334_vm12 = vcmask 769024   ;;  %vm262_vm13 = vcmask 908288  }
  0x36   :  { %162 = vrot.lane.b32.xlu0 %v159_v62, %s710_s2  ;;  %355 = vrot.lane.b32.xlu1 %v352_v63, %s710_s2  ;;  %v109_v53 = vand.u32 127, %v108_v50  ;;  %vm321_vm14 = vcmask 777216   ;;  %s1053_s2 = sld [smem:[#allocation3 + $0x11]] }
  0x38   :  { %v110_v56 = vadd.s32 128, %v109_v53  ;;  %v115_v59 = vand.u32 15, %v109_v53 }
  0x3a   :  { %v122_v60 = vand.u32 15, %v110_v56  ;;  %v900_v63 = vadd.s32 4294967295, %v115_v59  ;;  %v283_v56 = vstv %s936_s20 }
  0x3c   :  { %vm137_vm3 = vcmp.ge.s32.totalorder %v900_v63, 0 }
  0xa3   :  { %v161_v0 = vpop.permute.xlu0 %160  ;;  %v354_v2 = vpop.permute.xlu1 %353 }
  0xa4   :  { %v772_v1 = vsel %vm164_vm2, 0.0, %v161_v0  ;;  %v783_v3 = vsel %vm164_vm2, 0.0, %v354_v2 }
  0xa5   :  { %269 = vrot.lane.b32.xlu1 %v772_v1, %s711_s30  ;;  %210 = vrot.lane.b32.xlu0 %v772_v1, %s712_s4  ;;  %v185_v7 = vmul.f32 %v184_v6, %v772_v1  ;;  %v250_v10 = vmul.f32 %v249_v9, %v772_v1  ;;  %v309_v12 = vmul.f32 %v308_v11, %v772_v1 }
  0xa6   :  { %v373_v17 = vmul.f32 %v372_v16, %v783_v3  ;;  %v431_v19 = vmul.f32 %v430_v18, %v783_v3  ;;  %v487_v31 = vmul.f32 %v486_v30, %v783_v3 }
  0xa8   :  { %v163_v4 = vpop.permute.xlu0 %162  ;;  %v356_v13 = vpop.permute.xlu1 %355 }
  0xa9   :  { %288 = vrot.lane.b32.xlu1 %v772_v1, %s713_s5  ;;  %229 = vrot.lane.b32.xlu0 %v772_v1, %s714_s6  ;;  %v794_v5 = vsel %vm164_vm2, %v161_v0, %v163_v4  ;;  %v170_v8 = vsel %vm164_vm2, %v163_v4, 0.0  ;;  %v362_v14 = vsel %vm164_vm2, %v356_v13, 0.0  ;;  %v822_v15 = vsel %vm164_vm2, %v354_v2, %v356_v13 }
  0xaa   :  { %v187_v20 = vmul.f32 %v184_v6, %v170_v8  ;;  %v186_v21 = vmul.f32 %v184_v6, %v794_v5  ;;  %v251_v22 = vmul.f32 %v249_v9, %v794_v5  ;;  %v252_v23 = vmul.f32 %v249_v9, %v170_v8 }
  0xab   :  { %v311_v24 = vmul.f32 %v308_v11, %v170_v8  ;;  %v310_v25 = vmul.f32 %v308_v11, %v794_v5  ;;  %v375_v26 = vmul.f32 %v372_v16, %v362_v14  ;;  %v374_v27 = vmul.f32 %v372_v16, %v822_v15 }
  0xac   :  { %v432_v28 = vmul.f32 %v430_v18, %v822_v15  ;;  %v433_v29 = vmul.f32 %v430_v18, %v362_v14  ;;  %v489_v32 = vmul.f32 %v486_v30, %v362_v14  ;;  %v488_v33 = vmul.f32 %v486_v30, %v822_v15 }
  0xad   :  { %449 = vrot.lane.b32.xlu1 %v783_v3, %s711_s30  ;;  %328 = vrot.lane.b32.xlu0 %v772_v1, %s715_s8  ;;  %v902_v0 = vadd.s32 4294967295, %v122_v60  ;;  %v912_v6 = vadd.s32 1, %v115_v59 }
  0xaf   :  { %vm138_vm4 = vcmp.ge.s32.totalorder %v902_v0, 0  ;;  %vm147_vm6 = vcmp.lt.s32.totalorder %v912_v6, 16  ;;  %v518_v0 = vstv %s1053_s2 }
  0xb0   :  { %v176_v11 = vsel %vm138_vm4, %v794_v5, 0.0 }
  0xb1   :  { %467 = vrot.lane.b32.xlu1 %v783_v3, %s713_s5  ;;  %393 = vrot.lane.b32.xlu0 %v783_v3, %s712_s4 }
  0xb5   :  { %411 = vrot.lane.b32.xlu0 %v783_v3, %s714_s6  ;;  %212 = vrot.lane.b32.xlu1 %v794_v5, %s712_s4 }
  0xb9   :  { %214 = vrot.lane.b32.xlu0 %v170_v8, %s712_s4  ;;  %191 = vrot.lane.b32.xlu1 %v185_v7, %s716_s10  ;;  %v914_v7 = vadd.s32 1, %v122_v60 }
  0xbb   :  { %vm148_vm7 = vcmp.lt.s32.totalorder %v914_v7, 16 }
  0xbd   :  { %233 = vrot.lane.b32.xlu0 %v170_v8, %s714_s6  ;;  %231 = vrot.lane.b32.xlu1 %v794_v5, %s714_s6 }
  0xc1   :  { %271 = vrot.lane.b32.xlu0 %v794_v5, %s711_s30  ;;  %273 = vrot.lane.b32.xlu1 %v170_v8, %s711_s30 }
  0xc5   :  { %256 = vrot.lane.b32.xlu0 %v250_v10, %s717_s12  ;;  %292 = vrot.lane.b32.xlu1 %v170_v8, %s713_s5  ;;  %v175_v10 = vsel %vm137_vm3, %v772_v1, 0.0 }
  0xc9   :  { %290 = vrot.lane.b32.xlu0 %v794_v5, %s713_s5  ;;  %330 = vrot.lane.b32.xlu1 %v794_v5, %s715_s8  ;;  %v152_v5 = vstv %s1097_s1  ;;  %s960_s1 = sld [smem:[#allocation3 + $0x8]] }
  0xcd   :  { %332 = vrot.lane.b32.xlu0 %v170_v8, %s715_s8  ;;  %315 = vrot.lane.b32.xlu1 %v309_v12, %s718_s14  ;;  %v178_v12 = vstv %s177_s17 }
  0xce   :  { %v179_v1 = vmul.f32 %v178_v12, %v175_v10  ;;  %v180_v18 = vmul.f32 %v178_v12, %v176_v11  ;;  %v302_v12 = vstv %s946_s23 }
  0xd1   :  { %397 = vrot.lane.b32.xlu0 %v362_v14, %s712_s4  ;;  %395 = vrot.lane.b32.xlu1 %v822_v15, %s712_s4 }
  0xd5   :  { %415 = vrot.lane.b32.xlu0 %v362_v14, %s714_s6  ;;  %379 = vrot.lane.b32.xlu1 %v373_v17, %s716_s10 }
  0xd9   :  { %451 = vrot.lane.b32.xlu0 %v822_v15, %s711_s30  ;;  %413 = vrot.lane.b32.xlu1 %v822_v15, %s714_s6 }
  0xdd   :  { %437 = vrot.lane.b32.xlu0 %v431_v19, %s717_s12  ;;  %453 = vrot.lane.b32.xlu1 %v362_v14, %s711_s30  ;;  %v224_v19 = vstv %s908_s18  ;;  %s720_s30 = smov [#allocation8]  }
  0xde   :  { %s587_s4 = sshll.u32 %s720_s30, 4  ;;  %s588_s4 = int_to_ptr.vmem [resolvable:$true] %s587_s4 }
  0xdf   :  { %p683_p0 = scmp.lt.s32.totalorder %s588_s4, %s588_s4 }
  0xe1   :  { %195 = vrot.lane.b32.xlu1 %v187_v20, %s716_s10  ;;  %193 = vrot.lane.b32.xlu0 %v186_v21, %s716_s10 }
  0xe5   :  { %471 = vrot.lane.b32.xlu1 %v362_v14, %s713_s5  ;;  %469 = vrot.lane.b32.xlu0 %v822_v15, %s713_s5  ;;  %s678_s5 = scalar_lea.vmem %s588_s4, 256 }
  0xe6   :  { %p679_p13 = scmp.ne.s32.totalorder %s588_s4, %s678_s5  ;;  %p684_p1 = scmp.lt.s32.totalorder %s678_s5, %s678_s5 }
  0xe8   :  { %p685_p2 = por %p684_p1, %p683_p0 }
  0xe9   :  { %258 = vrot.lane.b32.xlu1 %v251_v22, %s717_s12  ;;  %260 = vrot.lane.b32.xlu0 %v252_v23, %s717_s12 }
  0xea   :  { %p686_p3 = pnand %p685_p2, %p679_p13 }
  0xed   :  { %319 = vrot.lane.b32.xlu1 %v311_v24, %s718_s14  ;;  %317 = vrot.lane.b32.xlu0 %v310_v25, %s718_s14  ;;  %v181_v25 = vadd.f32 %v179_v1, %v152_v5 }
  0xf1   :  { %507 = vrot.lane.b32.xlu1 %v822_v15, %s715_s8  ;;  %505 = vrot.lane.b32.xlu0 %v783_v3, %s715_s8 }
  0xf5   :  { %383 = vrot.lane.b32.xlu1 %v375_v26, %s716_s10  ;;  %381 = vrot.lane.b32.xlu0 %v374_v27, %s716_s10  ;;  %v182_v26 = vadd.f32 %v180_v18, %v152_v5 }
  0xf9   :  { %439 = vrot.lane.b32.xlu1 %v432_v28, %s717_s12  ;;  %441 = vrot.lane.b32.xlu0 %v433_v29, %s717_s12 }
  0xfd   :  { %493 = vrot.lane.b32.xlu1 %v487_v31, %s718_s14  ;;  %509 = vrot.lane.b32.xlu0 %v362_v14, %s715_s8 }
 0x101   :  { %497 = vrot.lane.b32.xlu1 %v489_v32, %s718_s14  ;;  %495 = vrot.lane.b32.xlu0 %v488_v33, %s718_s14 }
 0x117   :  { %v865_v34 = vpop.permute.xlu1 %269  ;;  %v211_v35 = vpop.permute.xlu0 %210 }
 0x11b   :  { %v867_v36 = vpop.permute.xlu1 %288  ;;  %v230_v37 = vpop.permute.xlu0 %229 }
 0x11f   :  { %v869_v38 = vpop.permute.xlu1 %449  ;;  %v871_v39 = vpop.permute.xlu0 %328 }
 0x123   :  { %v873_v40 = vpop.permute.xlu1 %467  ;;  %v875_v41 = vpop.permute.xlu0 %393 }
 0x127   :  { %v213_v42 = vpop.permute.xlu1 %212  ;;  %v877_v43 = vpop.permute.xlu0 %411 }
 0x128   :  { %v217_v13 = vsel %vm216_vm5, %v211_v35, %v213_v42 }
 0x129   :  { %v221_v20 = vsel %vm147_vm6, %v217_v13, 0.0 }
 0x12a   :  { %v225_v28 = vmul.f32 %v224_v19, %v221_v20 }
 0x12b   :  { %v192_v44 = vpop.permute.xlu1 %191  ;;  %v215_v45 = vpop.permute.xlu0 %214 }
 0x12c   :  { %v218_v14 = vsel %vm216_vm5, %v213_v42, %v215_v45 }
 0x12d   :  { %v222_v21 = vsel %vm148_vm7, %v218_v14, 0.0 }
 0x12e   :  { %v226_v31 = vmul.f32 %v224_v19, %v222_v21 }
 0x12f   :  { %v232_v46 = vpop.permute.xlu1 %231  ;;  %v234_v47 = vpop.permute.xlu0 %233 }
 0x130   :  { %v236_v22 = vsel %vm235_vm8, %v230_v37, %v232_v46  ;;  %v237_v23 = vsel %vm235_vm8, %v232_v46, %v234_v47  ;;  %v243_v37 = vstv %s928_s19 }
 0x131   :  { %v240_v42 = vsel %vm137_vm3, %v236_v22, 0.0  ;;  %v241_v45 = vsel %vm138_vm4, %v237_v23, 0.0 }
 0x132   :  { %v244_v60 = vmul.f32 %v243_v37, %v240_v42  ;;  %v245_v10 = vmul.f32 %v243_v37, %v241_v45 }
 0x133   :  { %v879_v48 = vpop.permute.xlu1 %273  ;;  %v881_v49 = vpop.permute.xlu0 %271 }
 0x134   :  { %v276_v32 = vsel %vm275_vm10, %v865_v34, %v881_v49 }
 0x135   :  { %v280_v59 = vsel %vm147_vm6, %v276_v32, 0.0 }
 0x136   :  { %v284_v13 = vmul.f32 %v283_v56, %v280_v59 }
 0x137   :  { %v883_v51 = vpop.permute.xlu1 %292  ;;  %v885_v52 = vpop.permute.xlu0 %256 }
 0x13b   :  { %v888_v54 = vpop.permute.xlu1 %330  ;;  %v890_v55 = vpop.permute.xlu0 %290 }
 0x13c   :  { %v335_v14 = vsel %vm334_vm12, %v871_v39, %v888_v54 }
 0x13f   :  { %v892_v57 = vpop.permute.xlu1 %315  ;;  %v894_v58 = vpop.permute.xlu0 %332 }
 0x140   :  { %v336_v39 = vsel %vm334_vm12, %v888_v54, %v894_v58  ;;  %v366_v58 = vstv %s972_s0 }
 0x141   :  { %v340_v54 = vsel %vm148_vm7, %v336_v39, 0.0 }
 0x143   :  { %v896_v61 = vpop.permute.xlu1 %395  ;;  %v898_v62 = vpop.permute.xlu0 %397 }
 0x144   :  { %v399_v42 = vsel %vm216_vm5, %v875_v41, %v896_v61 }
 0x147   :  { %v904_v2 = vpop.permute.xlu1 %379  ;;  %v906_v4 = vpop.permute.xlu0 %415 }
 0x14b   :  { %v916_v8 = vpop.permute.xlu1 %413  ;;  %v918_v9 = vpop.permute.xlu0 %451 }
 0x14c   :  { %v417_v41 = vsel %vm235_vm8, %v877_v43, %v916_v8  ;;  %v455_v43 = vsel %vm275_vm10, %v869_v38, %v918_v9 }
 0x14f   :  { %v932_v16 = vpop.permute.xlu1 %453  ;;  %v934_v17 = vpop.permute.xlu0 %437 }
 0x150   :  { %v456_v38 = vsel %vm275_vm10, %v918_v9, %v932_v16 }
 0x153   :  { %v196_v24 = vpop.permute.xlu1 %195  ;;  %v194_v27 = vpop.permute.xlu0 %193 }
 0x154   :  { %v198_v29 = vsel %vm197_vm9, %v192_v44, %v194_v27  ;;  %v199_v30 = vsel %vm197_vm9, %v194_v27, %v196_v24  ;;  %v277_v44 = vsel %vm275_vm10, %v881_v49, %v879_v48  ;;  %v295_v48 = vsel %vm294_vm11, %v867_v36, %v890_v55 }
 0x155   :  { %v202_v33 = vadd.f32 %v198_v29, %v181_v25  ;;  %v203_v35 = vadd.f32 %v199_v30, %v182_v26  ;;  %v296_v49 = vsel %vm294_vm11, %v890_v55, %v883_v51  ;;  %v281_v11 = vsel %vm148_vm7, %v277_v44, 0.0 }
 0x156   :  { %v299_v36 = vsel %vm137_vm3, %v295_v48, 0.0  ;;  %v300_v51 = vsel %vm138_vm4, %v296_v49, 0.0  ;;  %v285_v21 = vmul.f32 %v283_v56, %v281_v11  ;;  %v342_v24 = vstv %s960_s1 }
 0x157   :  { %v227_v46 = vadd.f32 %v225_v28, %v202_v33  ;;  %v228_v47 = vadd.f32 %v226_v31, %v203_v35  ;;  %v965_v34 = vpop.permute.xlu1 %471  ;;  %v967_v53 = vpop.permute.xlu0 %469  ;;  %v339_v25 = vsel %vm147_vm6, %v335_v14, 0.0  ;;  %v304_v26 = vmul.f32 %v302_v12, %v300_v51 }
 0x158   :  { %v363_v33 = vsel %vm137_vm3, %v783_v3, 0.0  ;;  %v364_v35 = vsel %vm138_vm4, %v822_v15, 0.0  ;;  %v343_v37 = vmul.f32 %v342_v24, %v339_v25  ;;  %v400_v3 = vsel %vm216_vm5, %v896_v61, %v898_v62 }
 0x159   :  { %v246_v18 = vadd.f32 %v244_v60, %v227_v46  ;;  %v247_v5 = vadd.f32 %v245_v10, %v228_v47  ;;  %v344_v46 = vmul.f32 %v342_v24, %v340_v54  ;;  %v367_v60 = vmul.f32 %v366_v58, %v363_v33 }
 0x15a   :  { %v368_v10 = vmul.f32 %v366_v58, %v364_v35  ;;  %v406_v48 = vstv %s996_s24  ;;  %v403_v49 = vsel %vm147_vm6, %v399_v42, 0.0  ;;  %v404_v11 = vsel %vm148_vm7, %v400_v3, 0.0 }
 0x15b   :  { %v259_v1 = vpop.permute.xlu1 %258  ;;  %v261_v19 = vpop.permute.xlu0 %260  ;;  %v408_v51 = vmul.f32 %v406_v48, %v404_v11  ;;  %v474_v24 = vsel %vm294_vm11, %v967_v53, %v965_v34 }
 0x15c   :  { %v263_v55 = vsel %vm262_vm13, %v885_v52, %v259_v1  ;;  %v264_v20 = vsel %vm262_vm13, %v259_v1, %v261_v19  ;;  %v303_v52 = vmul.f32 %v302_v12, %v299_v36  ;;  %v424_v12 = vstv %s1001_s25 }
 0x15d   :  { %v267_v22 = vadd.f32 %v263_v55, %v246_v18  ;;  %v268_v23 = vadd.f32 %v264_v20, %v247_v5  ;;  %v407_v5 = vmul.f32 %v406_v48, %v403_v49 }
 0x15f   :  { %v286_v27 = vadd.f32 %v284_v13, %v267_v22  ;;  %v287_v28 = vadd.f32 %v285_v21, %v268_v23  ;;  %v320_v29 = vpop.permute.xlu1 %319  ;;  %v318_v30 = vpop.permute.xlu0 %317  ;;  %v462_v22 = vstv %s1015_s28  ;;  %v459_v23 = vsel %vm147_vm6, %v455_v43, 0.0 }
 0x160   :  { %v322_v45 = vsel %vm321_vm14, %v892_v57, %v318_v30  ;;  %v323_v44 = vsel %vm321_vm14, %v318_v30, %v320_v29  ;;  %v418_v57 = vsel %vm235_vm8, %v916_v8, %v906_v4  ;;  %v421_v4 = vsel %vm137_vm3, %v417_v41, 0.0 }
 0x161   :  { %v305_v31 = vadd.f32 %v303_v52, %v286_v27  ;;  %v306_v32 = vadd.f32 %v304_v26, %v287_v28  ;;  %v422_v8 = vsel %vm138_vm4, %v418_v57, 0.0  ;;  %v425_v21 = vmul.f32 %v424_v12, %v421_v4 }
 0x162   :  { %v426_v39 = vmul.f32 %v424_v12, %v422_v8  ;;  %v460_v26 = vsel %vm148_vm7, %v456_v38, 0.0  ;;  %v463_v27 = vmul.f32 %v462_v22, %v459_v23  ;;  %v480_v28 = vstv %s1032_s29 }
 0x163   :  { %v326_v15 = vadd.f32 %v322_v45, %v305_v31  ;;  %v327_v47 = vadd.f32 %v323_v44, %v306_v32  ;;  %v508_v56 = vpop.permute.xlu1 %507  ;;  %v506_v59 = vpop.permute.xlu0 %505  ;;  %v464_v58 = vmul.f32 %v462_v22, %v460_v26  ;;  %v719_v8 = vmov 1966171168  }
 0x164   :  { %v511_v31 = vsel %vm334_vm12, %v506_v59, %v508_v56 }
 0x165   :  { %v345_v61 = vadd.f32 %v343_v37, %v326_v15  ;;  %v346_v62 = vadd.f32 %v344_v46, %v327_v47  ;;  %v515_v3 = vsel %vm147_vm6, %v511_v31, 0.0 }
 0x167   :  { %v384_v13 = vpop.permute.xlu1 %383  ;;  %v369_v14 = vadd.f32 %v367_v60, %v345_v61  ;;  %v370_v1 = vadd.f32 %v368_v10, %v346_v62  ;;  %v382_v18 = vpop.permute.xlu0 %381 }
 0x168   :  { %v385_v19 = vsel %vm197_vm9, %v904_v2, %v382_v18  ;;  %v386_v36 = vsel %vm197_vm9, %v382_v18, %v384_v13  ;;  %v473_v2 = vsel %vm294_vm11, %v873_v40, %v967_v53  ;;  %v478_v40 = vsel %vm138_vm4, %v474_v24, 0.0 }
 0x169   :  { %v389_v55 = vadd.f32 %v385_v19, %v369_v14  ;;  %v390_v20 = vadd.f32 %v386_v36, %v370_v1  ;;  %v477_v54 = vsel %vm137_vm3, %v473_v2, 0.0  ;;  %v482_v45 = vmul.f32 %v480_v28, %v478_v40 }
 0x16a   :  { %v481_v63 = vmul.f32 %v480_v28, %v477_v54  ;;  %v539_v13 = vunpack.c.l.s4 %v719_v8  ;;  %v542_v1 = vshrl.u32 %v108_v50, 7 }
 0x16b   :  { %v409_v9 = vadd.f32 %v407_v5, %v389_v55  ;;  %v410_v16 = vadd.f32 %v408_v51, %v390_v20  ;;  %v440_v25 = vpop.permute.xlu1 %439  ;;  %v442_v52 = vpop.permute.xlu0 %441 }
 0x16c   :  { %v443_v34 = vsel %vm262_vm13, %v934_v17, %v440_v25  ;;  %v444_v53 = vsel %vm262_vm13, %v440_v25, %v442_v52  ;;  %v540_v14 = vunpack.c.0.s8 %v539_v13  ;;  %v562_v38 = vsub.s32 0, %v542_v1 }
 0x16d   :  { %v427_v29 = vadd.f32 %v425_v21, %v409_v9  ;;  %v428_v30 = vadd.f32 %v426_v39, %v410_v16  ;;  %v566_v55 = vsub.s32 1, %v542_v1 }
 0x16e   :  { %v543_v5 = vsub.s32 %v540_v14, %v542_v1 }
 0x16f   :  { %v447_v32 = vadd.f32 %v443_v34, %v427_v29  ;;  %v448_v33 = vadd.f32 %v444_v53, %v428_v30  ;;  %v494_v35 = vpop.permute.xlu1 %493  ;;  %v510_v37 = vpop.permute.xlu0 %509 }
 0x170   :  { %v512_v42 = vsel %vm334_vm12, %v508_v56, %v510_v37  ;;  %v519_v56 = vmul.f32 %v518_v0, %v515_v3 }
 0x171   :  { %v465_v44 = vadd.f32 %v463_v27, %v447_v32  ;;  %v466_v46 = vadd.f32 %v464_v58, %v448_v33  ;;  %v516_v17 = vsel %vm148_vm7, %v512_v42, 0.0 }
 0x172   :  { %v520_v10 = vmul.f32 %v518_v0, %v516_v17 }
 0x173   :  { %v498_v15 = vpop.permute.xlu1 %497  ;;  %v483_v47 = vadd.f32 %v481_v63, %v465_v44  ;;  %v484_v59 = vadd.f32 %v482_v45, %v466_v46  ;;  %v496_v41 = vpop.permute.xlu0 %495 }
 0x174   :  { %v499_v57 = vsel %vm321_vm14, %v494_v35, %v496_v41  ;;  %v500_v60 = vsel %vm321_vm14, %v496_v41, %v498_v15 }
 0x175   :  { %v503_v48 = vadd.f32 %v499_v57, %v483_v47  ;;  %v504_v49 = vadd.f32 %v500_v60, %v484_v59 }
 0x177   :  { %v521_v61 = vadd.f32 %v519_v56, %v503_v48  ;;  %v522_v62 = vadd.f32 %v520_v10, %v504_v49 }
 0x179   :  { %v617_v11 = vmul.f32 -1.442695, %v521_v61  ;;  %v618_v6 = vmul.f32 -1.442695, %v522_v62 }
 0x17b   :  { %636 = vpow2.f32 %v617_v11 }
 0x17c   :  { %638 = vpow2.f32 %v618_v6 }
 0x185   :  { %v637_v7 = vpop.eup %636 }
 0x186   :  { %v639_v12 = vpop.eup %638  ;;  %v529_v43 = vadd.f32 1.0, %v637_v7 }
 0x187   :  { %v530_v4 = vadd.f32 1.0, %v639_v12 }
 0x188   :  { %640 = vrcp.f32 %v529_v43 }
 0x189   :  { %642 = vrcp.f32 %v530_v4 }
 0x192   :  { %v641_v18 = vpop.eup %640 }
 0x193   :  { %v643_v19 = vpop.eup %642 }
 0x194   :  { %v537_v36 = vcombine.low %v641_v18, %v643_v19 }
 0x196   :  { %v544_v51 = vrot.slane %v537_v36, %v543_v5 }
 0x198   :  { %v545_v20 = vcombine.high %v544_v51, %v544_v51  ;;  %v552_v21 = vrot.slane %v544_v51, %v543_v5 }
 0x19a   :  { %v559_v39 = vrot.slane %v545_v20, %v543_v5  ;;  %v563_v22 = vrot.slane %v552_v21, %v562_v38  ;;  %v567_v23 = vrot.slane %v552_v21, %v566_v55 }
 0x19c   :  { %v571_v2 = vrot.slane %v559_v39, %v562_v38  ;;  %v575_v24 = vrot.slane %v559_v39, %v566_v55  ;;  %v576_v9 = vcombine.low %v563_v22, %v567_v23 }
 0x19e   :  { %v577_v16 = vcombine.low %v571_v2, %v575_v24  ;;  %580 = vst [vmem:[#allocation8] sm:$0xff] %v576_v9 }
 0x1a0   :  { %581 = vst [vmem:[#allocation8 + $0x8] sm:$0xff] %v577_v16 }
 0x1a1   :  { %689 = shalt.err (!%p686_p3)
}
 0x1a2   :  { %s690_s8 = scalar_lea.hbm %s1099_s3, 256 }
 0x1a3   :  { %p691_p4 = scmp.ne.s32.totalorder %s1099_s3, %s690_s8  ;;  %p694_p5 = scmp.lt.u32.totalorder %s690_s8, %s1099_s3 }
 0x1a5   :  { %p696_p6 = pnand %p694_p5, %p691_p4 }
 0x1a7   :  { %699 = shalt.err (!%p696_p6)
}
 0x1a8   :  { %593 = dma.vmem_to_hbm [thread:$0]  %s588_s4, 256, %s1099_s3, [#allocation5], %s708_s26, %s708_s26, %s709_s27  }
 0x1a9   :  { %704 = dma.done.wait [#allocation5], 256  }
 0x1aa   :  { %705 = vsyncadd [#allocation5], 4294967040 }
 0x1ab   :  { %597 = vsyncpa [#allocation4], 1 }
 0x1ac   :  { %598 = vsyncpa [#allocation5], 1 }
 0x1ad   :  { %599 = vsyncpa [#allocation6], 1 }

</bundles_post_ra>
